<compile_context>
chip_gen: v7x
topology: tpu7x:2x2x1
jax: 0.10.0
libtpu: 0.0.40
codegen_flags: <defaults>
</compile_context>

<pallas_src>
import jax
import jax.numpy as jnp
import numpy as np
from jax.experimental import pallas as pl
from jax.experimental.pallas import tpu as pltpu

KH = KW = 4
STRIDE = 2
PAD = 1
BN_EPS = 1e-5
LRELU_SLOPE = 0.2

VMEM_WS_CAP = 36 * 1024 * 1024   # double-buffered working-set cap (fits v7x 64 MiB)
VMEM_LIMIT = 48 * 1024 * 1024    # scoped-VMEM request (safe on v5e/v6e/v7x)


def _round_up(x, m):
    return (x + m - 1) // m * m


# ---------- Pass 1: conv-as-matmul (MXU) + per-M-tile partial channel stats ----------
def _conv_stats_kernel(p_ref, w_ref, y_ref, s1_ref, s2_ref, acc_ref):
    # p_ref: (TM, TK) bf16 patch tile      w_ref: (TK, C_pad) bf16 weight tile
    # y_ref: (TM, C_pad) bf16 conv output  s1/s2: (8, C_pad) f32 per-tile partial stats
    # acc_ref: (TM, C_pad) f32 accumulator over the K grid axis (VMEM scratch)
    k = pl.program_id(1)
    nk = pl.num_programs(1)

    @pl.when(k == 0)
    def _():
        acc_ref[...] = jnp.zeros_like(acc_ref)

    acc_ref[...] += jnp.dot(p_ref[...], w_ref[...],
                            preferred_element_type=jnp.float32)

    @pl.when(k == nk - 1)
    def _():
        y = acc_ref[...]                       # f32, before the bf16 cast
        y_ref[...] = y.astype(y_ref.dtype)
        # Per-channel (cross-row) sums via the MXU (ones @ y) instead of XLU
        # cross-sublane reductions.  8 replicated rows keep the stats block
        # sublane-aligned ((8, 128) rule) at negligible extra MXU cost.
        ones = jnp.ones((8, y.shape[0]), jnp.float32)
        s1_ref[...] = jnp.dot(ones, y, preferred_element_type=jnp.float32)
        s2_ref[...] = jnp.dot(ones, y * y, preferred_element_type=jnp.float32)


# ---------- Pass 2: pre-folded BatchNorm (one FMA) + LeakyReLU ------------------------
def _bn_lrelu_kernel(y_ref, scale_ref, bias_ref, o_ref):
    z = y_ref[...].astype(jnp.float32) * scale_ref[...] + bias_ref[...]
    o_ref[...] = jnp.where(z >= 0.0, z, LRELU_SLOPE * z).astype(o_ref.dtype)


def _im2col(x_nchw, dtype):
    """NCHW -> (M, K) patch matrix (K = KH*KW*Cin) in `dtype`, plus (N, OH, OW)."""
    n, cin, h, w = x_nchw.shape
    oh = (h + 2 * PAD - KH) // STRIDE + 1
    ow = (w + 2 * PAD - KW) // STRIDE + 1
    x_nhwc = jnp.transpose(x_nchw.astype(dtype), (0, 2, 3, 1))
    x_pad = jnp.pad(x_nhwc, ((0, 0), (PAD, PAD), (PAD, PAD), (0, 0)))
    cols = []
    for ky in range(KH):
        for kx in range(KW):
            cols.append(x_pad[:, ky:ky + STRIDE * oh:STRIDE,
                              kx:kx + STRIDE * ow:STRIDE, :])     # (N,OH,OW,Cin)
    # order (ky, kx, ci) must match the weight flattening below.
    patches = jnp.stack(cols, axis=3)                             # (N,OH,OW,16,Cin)
    patches = patches.reshape(n * oh * ow, KH * KW * cin)         # (M, K)
    return patches, (n, oh, ow)


def patch_forward(x_nchw, conv_w, gamma, beta, out_dtype=jnp.float32):
    """Forward pass of Patch.  conv_w: (Cout, Cin, KH, KW) PyTorch layout."""
    cout, cin = conv_w.shape[0], conv_w.shape[1]
    patches, (n, oh, ow) = _im2col(x_nchw, jnp.bfloat16)
    m, k = patches.shape

    # Channel (lane) padding: 128 minimum; 256 once Cout is large enough to feed the
    # full 2x256 MXU on v6e/v7x (extra lanes are zeros, so it is free).
    c_align = 256 if cout >= 128 else 128
    c_pad = _round_up(cout, c_align)

    # K tiling: a single full-K tile (weights stay VMEM-resident across all M tiles)
    # unless K is large, in which case a fixed 1024 tile with cdiv-style padding.
    k_al = _round_up(k, 128)
    tk = k_al if k_al <= 2048 else 1024
    k_pad = _round_up(k, tk)
    n_k = k_pad // tk

    # M tiling: biggest row tile whose double-buffered working set stays under the cap.
    tm = 2048 if c_pad <= 128 else 1024

    def _working_set(tm_):
        return (2 * tm_ * tk * 2           # patches in (bf16, double-buffered)
                + 2 * tk * c_pad * 2       # weights in (bf16)
                + 2 * tm_ * c_pad * 2      # y out (bf16)
                + 2 * 2 * 8 * c_pad * 4    # partial stats out (f32)
                + tm_ * c_pad * 4)         # f32 accumulator scratch

    while tm > 8 and _working_set(tm) > VMEM_WS_CAP:
        tm //= 2
    tm = min(tm, _round_up(m, 8))
    m_pad = _round_up(m, tm)
    n_m = m_pad // tm

    patches_p = jnp.pad(patches, ((0, m_pad - m), (0, k_pad - k)))
    # (Cout,Cin,KH,KW) -> (KH,KW,Cin,Cout) -> (K, Cout) -> zero pad to (K_pad, C_pad)
    w_mat = jnp.transpose(conv_w.astype(jnp.bfloat16), (2, 3, 1, 0)).reshape(k, cout)
    w_mat = jnp.pad(w_mat, ((0, k_pad - k), (0, c_pad - cout)))
    gamma_p = jnp.pad(gamma.astype(jnp.float32), (0, c_pad - cout))
    beta_p = jnp.pad(beta.astype(jnp.float32), (0, c_pad - cout))

    # ---- Pass 1: conv + per-tile partial channel statistics ------------------------
    y_flat, s1_p, s2_p = pl.pallas_call(
        _conv_stats_kernel,
        out_shape=(
            jax.ShapeDtypeStruct((m_pad, c_pad), jnp.bfloat16),
            jax.ShapeDtypeStruct((8 * n_m, c_pad), jnp.float32),
            jax.ShapeDtypeStruct((8 * n_m, c_pad), jnp.float32),
        ),
        grid=(n_m, n_k),
        in_specs=[
            pl.BlockSpec((tm, tk), lambda i, kk: (i, kk)),
            pl.BlockSpec((tk, c_pad), lambda i, kk: (kk, 0)),
        ],
        out_specs=(
            pl.BlockSpec((tm, c_pad), lambda i, kk: (i, 0)),
            pl.BlockSpec((8, c_pad), lambda i, kk: (i, 0)),
            pl.BlockSpec((8, c_pad), lambda i, kk: (i, 0)),
        ),
        scratch_shapes=[pltpu.VMEM((tm, c_pad), jnp.float32)],
        compiler_params=pltpu.CompilerParams(
            # M tiles are fully independent (disjoint y rows + per-tile stats) ->
            # parallel; K carries the VMEM-resident accumulator -> arbitrary.
            dimension_semantics=("parallel", "arbitrary"),
            vmem_limit_bytes=VMEM_LIMIT),
    )(patches_p, w_mat)

    # ---- Fold BN into per-channel scale/bias (tiny (n_m, C_pad) wrapper reduction) --
    s1 = jnp.sum(s1_p.reshape(n_m, 8, c_pad)[:, 0, :], axis=0)     # (C_pad,)
    s2 = jnp.sum(s2_p.reshape(n_m, 8, c_pad)[:, 0, :], axis=0)
    mean = s1 / float(m)                       # zero-padded M rows contribute nothing
    var = jnp.maximum(s2 / float(m) - mean * mean, 0.0)
    scale = (gamma_p * jax.lax.rsqrt(var + BN_EPS)).reshape(1, c_pad)
    bias = (beta_p - mean * scale[0]).reshape(1, c_pad)

    # ---- Pass 2: folded BN (single FMA sweep) + LeakyReLU, parallel over row tiles --
    out_flat = pl.pallas_call(
        _bn_lrelu_kernel,
        out_shape=jax.ShapeDtypeStruct((m_pad, c_pad), out_dtype),
        grid=(n_m,),
        in_specs=[
            pl.BlockSpec((tm, c_pad), lambda i: (i, 0)),
            pl.BlockSpec((1, c_pad), lambda i: (0, 0)),
            pl.BlockSpec((1, c_pad), lambda i: (0, 0)),
        ],
        out_specs=pl.BlockSpec((tm, c_pad), lambda i: (i, 0)),
        compiler_params=pltpu.CompilerParams(
            dimension_semantics=("parallel",),
            vmem_limit_bytes=VMEM_LIMIT),
    )(y_flat, scale, bias)

    # Strip M / Cout padding, (M, Cout) -> (N, OH, OW, Cout) -> NCHW (PyTorch layout).
    out = out_flat[:m, :cout].reshape(n, oh, ow, cout)
    return jnp.transpose(out, (0, 3, 1, 2))


def _reference(x_nchw, conv_w, gamma, beta):
    """Plain-JAX f32 reference (same semantics as the PyTorch module in train mode)."""
    y = jax.lax.conv_general_dilated(
        x_nchw.astype(jnp.float32), conv_w.astype(jnp.float32),
        window_strides=(STRIDE, STRIDE), padding=((PAD, PAD), (PAD, PAD)),
        dimension_numbers=("NCHW", "OIHW", "NCHW"))
    mean = jnp.mean(y, axis=(0, 2, 3), keepdims=True)
    var = jnp.mean((y - mean) ** 2, axis=(0, 2, 3), keepdims=True)
    yh = (y - mean) * jax.lax.rsqrt(var + BN_EPS)
    z = yh * gamma.reshape(1, -1, 1, 1) + beta.reshape(1, -1, 1, 1)
    return jnp.where(z >= 0.0, z, LRELU_SLOPE * z)


if __name__ == "__main__":
    in_dim, out_dim = 4, 8
    n, h, w = 2, 16, 16

    key = jax.random.PRNGKey(0)
    kx, kw, kg, kb = jax.random.split(key, 4)

    x = jax.random.normal(kx, (n, in_dim, h, w), dtype=jnp.float32)
    # PyTorch shapes: Conv2d weight (Cout, Cin, KH, KW); BN affine params (Cout,)
    conv_w = jax.random.normal(kw, (out_dim, in_dim, KH, KW), dtype=jnp.float32) * 0.1
    gamma = 1.0 + 0.1 * jax.random.normal(kg, (out_dim,), dtype=jnp.float32)
    beta = 0.1 * jax.random.normal(kb, (out_dim,), dtype=jnp.float32)

    fwd = jax.jit(patch_forward)
    out = jax.block_until_ready(fwd(x, conv_w, gamma, beta))
    ref = jax.block_until_ready(_reference(x, conv_w, gamma, beta))
    # bf16 patch/weight/y streams (f32 accumulation) -> looser tolerance than all-f32 v1.
    np.testing.assert_allclose(np.asarray(out), np.asarray(ref), rtol=3e-2, atol=3e-2)

    print("KERNEL_OK")
</pallas_src>

<mosaic_0001>
module attributes {stable_mosaic.version = 11 : i64} {
  func.func @_bn_lrelu_kernel(%arg0: i32, %arg1: memref<128x128xbf16, #tpu.memory_space<vmem>>, %arg2: memref<1x128xf32, #tpu.memory_space<vmem>>, %arg3: memref<1x128xf32, #tpu.memory_space<vmem>>, %arg4: memref<128x128xf32, #tpu.memory_space<vmem>>) attributes {dimension_semantics = [#tpu.dimension_semantics<parallel>], iteration_bounds = array<i64: 1>, scalar_prefetch = 0 : i64, scratch_operands = 0 : i64, tpu.core_type = #tpu.core_type<tc>, window_params = [{transform_indices = @transform_0, window_bounds = array<i64: 128, 128>}, {pipeline_mode = #tpu.pipeline_mode<synchronous>, transform_indices = @transform_1, window_bounds = array<i64: 1, 128>}, {pipeline_mode = #tpu.pipeline_mode<synchronous>, transform_indices = @transform_2, window_bounds = array<i64: 1, 128>}, {transform_indices = @transform_3, window_bounds = array<i64: 128, 128>}]} {
    %c0 = arith.constant 0 : index
    %c0_0 = arith.constant 0 : index
    %0 = vector.load %arg1[%c0, %c0_0] : memref<128x128xbf16, #tpu.memory_space<vmem>>, vector<128x128xbf16>
    %1 = arith.extf %0 : vector<128x128xbf16> to vector<128x128xf32>
    %c0_1 = arith.constant 0 : index
    %c0_2 = arith.constant 0 : index
    %2 = vector.load %arg2[%c0_1, %c0_2] : memref<1x128xf32, #tpu.memory_space<vmem>>, vector<1x128xf32>
    %3 = vector.broadcast %2 : vector<1x128xf32> to vector<128x128xf32>
    %4 = arith.mulf %1, %3 : vector<128x128xf32>
    %c0_3 = arith.constant 0 : index
    %c0_4 = arith.constant 0 : index
    %5 = vector.load %arg3[%c0_3, %c0_4] : memref<1x128xf32, #tpu.memory_space<vmem>>, vector<1x128xf32>
    %6 = vector.broadcast %5 : vector<1x128xf32> to vector<128x128xf32>
    %7 = arith.addf %4, %6 : vector<128x128xf32>
    %cst = arith.constant 0.000000e+00 : f32
    %8 = vector.broadcast %cst : f32 to vector<128x128xf32>
    %9 = arith.cmpf oge, %7, %8 : vector<128x128xf32>
    %cst_5 = arith.constant 2.000000e-01 : f32
    %10 = vector.broadcast %cst_5 : f32 to vector<128x128xf32>
    %11 = arith.mulf %10, %7 : vector<128x128xf32>
    %12 = arith.select %9, %7, %11 : vector<128x128xi1>, vector<128x128xf32>
    %c0_6 = arith.constant 0 : index
    %c0_7 = arith.constant 0 : index
    %13 = vector.load %arg4[%c0_6, %c0_7] : memref<128x128xf32, #tpu.memory_space<vmem>>, vector<128x128xf32>
    tpu.vector_store %arg4[%c0_6, %c0_7], %12 {strides = array<i32>} : memref<128x128xf32, #tpu.memory_space<vmem>>, vector<128x128xf32>,
    return
  }
  func.func @transform_0(%arg0: i32) -> (i32, i32) {
    %c0_i32 = arith.constant 0 : i32
    %c0_i32_0 = arith.constant 0 : i32
    return %arg0, %c0_i32 : i32, i32
  }
  func.func @transform_1(%arg0: i32) -> (i32, i32) {
    %c0_i32 = arith.constant 0 : i32
    %c0_i32_0 = arith.constant 0 : i32
    %c0_i32_1 = arith.constant 0 : i32
    return %c0_i32, %c0_i32_0 : i32, i32
  }
  func.func @transform_2(%arg0: i32) -> (i32, i32) {
    %c0_i32 = arith.constant 0 : i32
    %c0_i32_0 = arith.constant 0 : i32
    %c0_i32_1 = arith.constant 0 : i32
    return %c0_i32, %c0_i32_0 : i32, i32
  }
  func.func @transform_3(%arg0: i32) -> (i32, i32) {
    %c0_i32 = arith.constant 0 : i32
    %c0_i32_0 = arith.constant 0 : i32
    return %arg0, %c0_i32 : i32, i32
  }
}

module attributes {stable_mosaic.version = 11 : i64} {
  func.func @_conv_stats_kernel(%arg0: i32, %arg1: i32, %arg2: memref<128x128xbf16, #tpu.memory_space<vmem>>, %arg3: memref<128x128xbf16, #tpu.memory_space<vmem>>, %arg4: memref<128x128xbf16, #tpu.memory_space<vmem>>, %arg5: memref<8x128xf32, #tpu.memory_space<vmem>>, %arg6: memref<8x128xf32, #tpu.memory_space<vmem>>, %arg7: memref<128x128xf32, #tpu.memory_space<vmem>>) attributes {dimension_semantics = [#tpu.dimension_semantics<parallel>, #tpu.dimension_semantics<arbitrary>], iteration_bounds = array<i64: 1, 1>, scalar_prefetch = 0 : i64, scratch_operands = 1 : i64, tpu.core_type = #tpu.core_type<tc>, window_params = [{transform_indices = @transform_0, window_bounds = array<i64: 128, 128>}, {transform_indices = @transform_1, window_bounds = array<i64: 128, 128>}, {transform_indices = @transform_2, window_bounds = array<i64: 128, 128>}, {transform_indices = @transform_3, window_bounds = array<i64: 8, 128>}, {transform_indices = @transform_4, window_bounds = array<i64: 8, 128>}]} {
    %c0_i32 = arith.constant 0 : i32
    %0 = arith.cmpi eq, %arg1, %c0_i32 : i32
    %1 = arith.extui %0 : i1 to i32
    %c0_i32_0 = arith.constant 0 : i32
    %2 = arith.cmpi ne, %1, %c0_i32_0 : i32
    scf.if %2 {
      %cst_10 = arith.constant 0.000000e+00 : f32
      %12 = vector.broadcast %cst_10 : f32 to vector<128x128xf32>
      %c0_11 = arith.constant 0 : index
      %c0_12 = arith.constant 0 : index
      %13 = vector.load %arg7[%c0_11, %c0_12] : memref<128x128xf32, #tpu.memory_space<vmem>>, vector<128x128xf32>
      tpu.vector_store %arg7[%c0_11, %c0_12], %12 {strides = array<i32>} : memref<128x128xf32, #tpu.memory_space<vmem>>, vector<128x128xf32>,
    } else {
    }
    %c0 = arith.constant 0 : index
    %c0_1 = arith.constant 0 : index
    %3 = vector.load %arg7[%c0, %c0_1] : memref<128x128xf32, #tpu.memory_space<vmem>>, vector<128x128xf32>
    %c0_2 = arith.constant 0 : index
    %c0_3 = arith.constant 0 : index
    %4 = vector.load %arg2[%c0_2, %c0_3] : memref<128x128xbf16, #tpu.memory_space<vmem>>, vector<128x128xbf16>
    %c0_4 = arith.constant 0 : index
    %c0_5 = arith.constant 0 : index
    %5 = vector.load %arg3[%c0_4, %c0_5] : memref<128x128xbf16, #tpu.memory_space<vmem>>, vector<128x128xbf16>
    %cst = arith.constant dense<0.000000e+00> : vector<128x128xf32>
    %6 = tpu.matmul %4, %5, %cst {dimension_numbers = #tpu.dot_dimension_numbers<[1], [0], [0], [1], [0, 0, 1, 1], [], []>} : vector<128x128xbf16>, vector<128x128xbf16>, vector<128x128xf32> -> vector<128x128xf32>
    %7 = arith.addf %3, %6 : vector<128x128xf32>
    %c0_6 = arith.constant 0 : index
    %c0_7 = arith.constant 0 : index
    %8 = vector.load %arg7[%c0_6, %c0_7] : memref<128x128xf32, #tpu.memory_space<vmem>>, vector<128x128xf32>
    tpu.vector_store %arg7[%c0_6, %c0_7], %7 {strides = array<i32>} : memref<128x128xf32, #tpu.memory_space<vmem>>, vector<128x128xf32>,
    %c0_i32_8 = arith.constant 0 : i32
    %9 = arith.cmpi eq, %arg1, %c0_i32_8 : i32
    %10 = arith.extui %9 : i1 to i32
    %c0_i32_9 = arith.constant 0 : i32
    %11 = arith.cmpi ne, %10, %c0_i32_9 : i32
    scf.if %11 {
      %c0_10 = arith.constant 0 : index
      %c0_11 = arith.constant 0 : index
      %12 = vector.load %arg7[%c0_10, %c0_11] : memref<128x128xf32, #tpu.memory_space<vmem>>, vector<128x128xf32>
      %13 = arith.truncf %12 : vector<128x128xf32> to vector<128x128xbf16>
      %c0_12 = arith.constant 0 : index
      %c0_13 = arith.constant 0 : index
      %14 = vector.load %arg4[%c0_12, %c0_13] : memref<128x128xbf16, #tpu.memory_space<vmem>>, vector<128x128xbf16>
      tpu.vector_store %arg4[%c0_12, %c0_13], %13 {strides = array<i32>} : memref<128x128xbf16, #tpu.memory_space<vmem>>, vector<128x128xbf16>,
      %cst_14 = arith.constant 1.000000e+00 : f32
      %15 = vector.broadcast %cst_14 : f32 to vector<8x128xf32>
      %cst_15 = arith.constant dense<0.000000e+00> : vector<8x128xf32>
      %16 = tpu.matmul %15, %12, %cst_15 {dimension_numbers = #tpu.dot_dimension_numbers<[1], [0], [0], [1], [0, 0, 1, 1], [], []>} : vector<8x128xf32>, vector<128x128xf32>, vector<8x128xf32> -> vector<8x128xf32>
      %c0_16 = arith.constant 0 : index
      %c0_17 = arith.constant 0 : index
      %17 = vector.load %arg5[%c0_16, %c0_17] : memref<8x128xf32, #tpu.memory_space<vmem>>, vector<8x128xf32>
      tpu.vector_store %arg5[%c0_16, %c0_17], %16 {strides = array<i32>} : memref<8x128xf32, #tpu.memory_space<vmem>>, vector<8x128xf32>,
      %18 = arith.mulf %12, %12 : vector<128x128xf32>
      %cst_18 = arith.constant dense<0.000000e+00> : vector<8x128xf32>
      %19 = tpu.matmul %15, %18, %cst_18 {dimension_numbers = #tpu.dot_dimension_numbers<[1], [0], [0], [1], [0, 0, 1, 1], [], []>} : vector<8x128xf32>, vector<128x128xf32>, vector<8x128xf32> -> vector<8x128xf32>
      %c0_19 = arith.constant 0 : index
      %c0_20 = arith.constant 0 : index
      %20 = vector.load %arg6[%c0_19, %c0_20] : memref<8x128xf32, #tpu.memory_space<vmem>>, vector<8x128xf32>
      tpu.vector_store %arg6[%c0_19, %c0_20], %19 {strides = array<i32>} : memref<8x128xf32, #tpu.memory_space<vmem>>, vector<8x128xf32>,
    } else {
    }
    return
  }
  func.func @transform_0(%arg0: i32, %arg1: i32) -> (i32, i32) {
    %c0_i32 = arith.constant 0 : i32
    return %arg0, %arg1 : i32, i32
  }
  func.func @transform_1(%arg0: i32, %arg1: i32) -> (i32, i32) {
    %c0_i32 = arith.constant 0 : i32
    %c0_i32_0 = arith.constant 0 : i32
    return %arg1, %c0_i32 : i32, i32
  }
  func.func @transform_2(%arg0: i32, %arg1: i32) -> (i32, i32) {
    %c0_i32 = arith.constant 0 : i32
    %c0_i32_0 = arith.constant 0 : i32
    return %arg0, %c0_i32 : i32, i32
  }
  func.func @transform_3(%arg0: i32, %arg1: i32) -> (i32, i32) {
    %c0_i32 = arith.constant 0 : i32
    %c0_i32_0 = arith.constant 0 : i32
    return %arg0, %c0_i32 : i32, i32
  }
  func.func @transform_4(%arg0: i32, %arg1: i32) -> (i32, i32) {
    %c0_i32 = arith.constant 0 : i32
    %c0_i32_0 = arith.constant 0 : i32
    return %arg0, %c0_i32 : i32, i32
  }
}

</mosaic_0001>

<bundles_post_ra>
// kernel: patch_forward.3
= control target key start
LH: loop header
LB: loop body
LE: loop exit
PB: predicated region body
PF: predicated region fallthrough
CT: control target
= control target key end

     0   :  { %s335_s0 = inlined_call_operand.vmem [shape: bf16[128,128], index: 0, kind: input, shape index: {}]   ;;  %s336_s1 = inlined_call_operand.vmem [shape: f32[1,128], index: 1, kind: input, shape index: {}]   ;;  %s337_s2 = inlined_call_operand.vmem [shape: f32[1,128], index: 2, kind: input, shape index: {}]   ;;  %s338_s3 = inlined_call_operand.vmem [shape: f32[128,128], index: 3, kind: output, shape index: {}]  }
   0x1   :  { %v163_v0 = vld [vmem:[%s335_s0] sm:$0xff]   ;;  %v194_v4 = vld [vmem:[%s335_s0 + $0x8] sm:$0xff]   ;;  %v195_v5 = vld [vmem:[%s335_s0 + $0x10] sm:$0xff]  }
   0x2   :  { %v227_v1 = vld [vmem:[%s336_s1] ss:$0 sm:$0xff]  ;;  %v164_v2 = vunpack.c.l.bf16 %v163_v0  ;;  %v165_v3 = vunpack.c.h.bf16 %v163_v0  ;;  %v196_v6 = vld [vmem:[%s335_s0 + $0x18] sm:$0xff]   ;;  %v168_v8 = vunpack.c.l.bf16 %v194_v4  ;;  %v169_v9 = vunpack.c.h.bf16 %v194_v4  ;;  %v198_v36 = vld [vmem:[%s335_s0 + $0x28] sm:$0xff]  }
   0x3   :  { %v241_v7 = vld [vmem:[%s337_s2] ss:$0 sm:$0xff]  ;;  %v172_v10 = vunpack.c.l.bf16 %v195_v5  ;;  %v173_v11 = vunpack.c.h.bf16 %v195_v5  ;;  %v176_v14 = vunpack.c.l.bf16 %v196_v6  ;;  %v177_v15 = vunpack.c.h.bf16 %v196_v6  ;;  %v199_v48 = vld [vmem:[%s335_s0 + $0x30] sm:$0xff]   ;;  %v200_v55 = vld [vmem:[%s335_s0 + $0x38] sm:$0xff]  }
   0x4   :  { %v53_v12 = vmul.f32 %v164_v2, %v227_v1  ;;  %v54_v13 = vmul.f32 %v165_v3, %v227_v1  ;;  %v55_v16 = vmul.f32 %v168_v8, %v227_v1  ;;  %v56_v17 = vmul.f32 %v169_v9, %v227_v1  ;;  %v197_v28 = vld [vmem:[%s335_s0 + $0x20] sm:$0xff]  }
   0x5   :  { %v57_v18 = vmul.f32 %v172_v10, %v227_v1  ;;  %v58_v19 = vmul.f32 %v173_v11, %v227_v1  ;;  %v59_v22 = vmul.f32 %v176_v14, %v227_v1  ;;  %v60_v23 = vmul.f32 %v177_v15, %v227_v1 }
   0x6   :  { %v76_v20 = vadd.f32 %v241_v7, %v53_v12  ;;  %v77_v21 = vadd.f32 %v241_v7, %v54_v13  ;;  %v78_v24 = vadd.f32 %v241_v7, %v55_v16  ;;  %v79_v25 = vadd.f32 %v241_v7, %v56_v17 }
   0x7   :  { %v80_v26 = vadd.f32 %v241_v7, %v57_v18  ;;  %v81_v27 = vadd.f32 %v241_v7, %v58_v19  ;;  %v82_v41 = vadd.f32 %v241_v7, %v59_v22  ;;  %v83_v42 = vadd.f32 %v241_v7, %v60_v23 }
   0x8   :  { %vm92_vm0 = vcmp.ge.f32.partialorder %v76_v20, 0.0  ;;  %v108_v29 = vmul.f32 0.2, %v76_v20  ;;  %vm93_vm1 = vcmp.ge.f32.partialorder %v77_v21, 0.0  ;;  %v109_v30 = vmul.f32 0.2, %v77_v21 }
   0x9   :  { %vm94_vm2 = vcmp.ge.f32.partialorder %v78_v24, 0.0  ;;  %v110_v31 = vmul.f32 0.2, %v78_v24  ;;  %vm95_vm3 = vcmp.ge.f32.partialorder %v79_v25, 0.0  ;;  %v111_v32 = vmul.f32 0.2, %v79_v25 }
   0xa   :  { %v124_v33 = vsel %vm92_vm0, %v76_v20, %v108_v29  ;;  %v125_v34 = vsel %vm93_vm1, %v77_v21, %v109_v30  ;;  %vm96_vm4 = vcmp.ge.f32.partialorder %v80_v26, 0.0  ;;  %v112_v35 = vmul.f32 0.2, %v80_v26 }
   0xb   :  { %140 = vst [vmem:[%s338_s3] sm:$0xff] %v124_v33  ;;  %141 = vst [vmem:[%s338_s3 + $0x8] sm:$0xff] %v125_v34  ;;  %v126_v37 = vsel %vm94_vm2, %v78_v24, %v110_v31  ;;  %v127_v38 = vsel %vm95_vm3, %v79_v25, %v111_v32  ;;  %vm97_vm5 = vcmp.ge.f32.partialorder %v81_v27, 0.0  ;;  %v113_v39 = vmul.f32 0.2, %v81_v27 }
   0xc   :  { %142 = vst [vmem:[%s338_s3 + $0x10] sm:$0xff] %v126_v37  ;;  %143 = vst [vmem:[%s338_s3 + $0x18] sm:$0xff] %v127_v38  ;;  %v128_v40 = vsel %vm96_vm4, %v80_v26, %v112_v35  ;;  %v180_v43 = vunpack.c.l.bf16 %v197_v28  ;;  %v181_v45 = vunpack.c.h.bf16 %v197_v28  ;;  %v184_v46 = vunpack.c.l.bf16 %v198_v36 }
   0xd   :  { %144 = vst [vmem:[%s338_s3 + $0x20] sm:$0xff] %v128_v40  ;;  %v129_v44 = vsel %vm97_vm5, %v81_v27, %v113_v39  ;;  %v185_v47 = vunpack.c.h.bf16 %v198_v36  ;;  %vm98_vm6 = vcmp.ge.f32.partialorder %v82_v41, 0.0  ;;  %v114_v49 = vmul.f32 0.2, %v82_v41 }
   0xe   :  { %145 = vst [vmem:[%s338_s3 + $0x28] sm:$0xff] %v129_v44  ;;  %vm99_vm7 = vcmp.ge.f32.partialorder %v83_v42, 0.0  ;;  %v115_v50 = vmul.f32 0.2, %v83_v42  ;;  %v61_v51 = vmul.f32 %v180_v43, %v227_v1  ;;  %v62_v52 = vmul.f32 %v181_v45, %v227_v1 }
   0xf   :  { %v63_v53 = vmul.f32 %v184_v46, %v227_v1  ;;  %v64_v54 = vmul.f32 %v185_v47, %v227_v1  ;;  %v130_v56 = vsel %vm98_vm6, %v82_v41, %v114_v49  ;;  %v188_v58 = vunpack.c.l.bf16 %v199_v48 }
  0x10   :  { %v131_v57 = vsel %vm99_vm7, %v83_v42, %v115_v50  ;;  %v189_v59 = vunpack.c.h.bf16 %v199_v48  ;;  %146 = vst [vmem:[%s338_s3 + $0x30] sm:$0xff] %v130_v56  ;;  %v84_v60 = vadd.f32 %v241_v7, %v61_v51  ;;  %v85_v61 = vadd.f32 %v241_v7, %v62_v52 }
  0x11   :  { %147 = vst [vmem:[%s338_s3 + $0x38] sm:$0xff] %v131_v57  ;;  %v86_v62 = vadd.f32 %v241_v7, %v63_v53  ;;  %v87_v63 = vadd.f32 %v241_v7, %v64_v54  ;;  %v65_v0 = vmul.f32 %v188_v58, %v227_v1  ;;  %v192_v3 = vunpack.c.l.bf16 %v200_v55 }
  0x12   :  { %v66_v2 = vmul.f32 %v189_v59, %v227_v1  ;;  %v193_v4 = vunpack.c.h.bf16 %v200_v55  ;;  %vm100_vm8 = vcmp.ge.f32.partialorder %v84_v60, 0.0  ;;  %v116_v5 = vmul.f32 0.2, %v84_v60 }
  0x13   :  { %vm101_vm9 = vcmp.ge.f32.partialorder %v85_v61, 0.0  ;;  %v117_v6 = vmul.f32 0.2, %v85_v61  ;;  %vm102_vm10 = vcmp.ge.f32.partialorder %v86_v62, 0.0  ;;  %v118_v8 = vmul.f32 0.2, %v86_v62 }
  0x14   :  { %vm103_vm11 = vcmp.ge.f32.partialorder %v87_v63, 0.0  ;;  %v119_v9 = vmul.f32 0.2, %v87_v63  ;;  %v132_v10 = vsel %vm100_vm8, %v84_v60, %v116_v5  ;;  %v88_v12 = vadd.f32 %v241_v7, %v65_v0 }
  0x15   :  { %v133_v11 = vsel %vm101_vm9, %v85_v61, %v117_v6  ;;  %v89_v13 = vadd.f32 %v241_v7, %v66_v2  ;;  %148 = vst [vmem:[%s338_s3 + $0x40] sm:$0xff] %v132_v10  ;;  %v134_v14 = vsel %vm102_vm10, %v86_v62, %v118_v8  ;;  %v67_v16 = vmul.f32 %v192_v3, %v227_v1 }
  0x16   :  { %149 = vst [vmem:[%s338_s3 + $0x48] sm:$0xff] %v133_v11  ;;  %v135_v15 = vsel %vm103_vm11, %v87_v63, %v119_v9  ;;  %v68_v17 = vmul.f32 %v193_v4, %v227_v1  ;;  %150 = vst [vmem:[%s338_s3 + $0x50] sm:$0xff] %v134_v14  ;;  %vm104_vm12 = vcmp.ge.f32.partialorder %v88_v12, 0.0  ;;  %v120_v18 = vmul.f32 0.2, %v88_v12 }
  0x17   :  { %151 = vst [vmem:[%s338_s3 + $0x58] sm:$0xff] %v135_v15  ;;  %vm105_vm13 = vcmp.ge.f32.partialorder %v89_v13, 0.0  ;;  %v121_v19 = vmul.f32 0.2, %v89_v13  ;;  %v90_v20 = vadd.f32 %v241_v7, %v67_v16 }
  0x18   :  { %v91_v21 = vadd.f32 %v241_v7, %v68_v17  ;;  %v136_v22 = vsel %vm104_vm12, %v88_v12, %v120_v18 }
  0x19   :  { %v137_v23 = vsel %vm105_vm13, %v89_v13, %v121_v19  ;;  %152 = vst [vmem:[%s338_s3 + $0x60] sm:$0xff] %v136_v22  ;;  %vm106_vm14 = vcmp.ge.f32.partialorder %v90_v20, 0.0  ;;  %v122_v1 = vmul.f32 0.2, %v90_v20 }
  0x1a   :  { %153 = vst [vmem:[%s338_s3 + $0x68] sm:$0xff] %v137_v23  ;;  %vm107_vm15 = vcmp.ge.f32.partialorder %v91_v21, 0.0  ;;  %v123_v24 = vmul.f32 0.2, %v91_v21 }
  0x1b   :  { %v138_v25 = vsel %vm106_vm14, %v90_v20, %v122_v1 }
  0x1c   :  { %v139_v26 = vsel %vm107_vm15, %v91_v21, %v123_v24  ;;  %154 = vst [vmem:[%s338_s3 + $0x70] sm:$0xff] %v138_v25 }
  0x1d   :  { %155 = vst [vmem:[%s338_s3 + $0x78] sm:$0xff] %v139_v26 }

// kernel: patch_forward.2
= control target key start
LH: loop header
LB: loop body
LE: loop exit
PB: predicated region body
PF: predicated region fallthrough
CT: control target
= control target key end

     0   :  { %v892_v16 = vmov 0.0|0.0   ;;  %vm893_vm0 = vmmov 0   ;;  %v894_v17 = vmov 0.0   ;;  %s1015_s1 = inlined_call_operand.vmem [shape: bf16[128,128], index: 1, kind: input, shape index: {}]   ;;  %s1016_s0 = inlined_call_operand.vmem [shape: bf16[128,128], index: 0, kind: input, shape index: {}]   ;;  %s1017_s2 = inlined_call_operand.vmem [shape: bf16[128,128], index: 2, kind: output, shape index: {0}]   ;;  %s1018_s3 = inlined_call_operand.vmem [shape: f32[8,128], index: 3, kind: output, shape index: {1}]   ;;  %s1019_s4 = inlined_call_operand.vmem [shape: f32[8,128], index: 4, kind: output, shape index: {2}]  }
   0x1   :  { %v876_v0 = vld [vmem:[%s1015_s1] sm:$0xff]   ;;  %v877_v1 = vld [vmem:[%s1015_s1 + $0x8] sm:$0xff]   ;;  %v878_v2 = vld [vmem:[%s1015_s1 + $0x10] sm:$0xff]   ;;  %824 = vmatprep.subr.bf16.mxu1 %v892_v16  ;;  %786 = vmatprep.mubr.msk.f32.mxu1 %vm893_vm0, %v894_v17 }
   0x2   :  { %722 = vmatprep.subr.bf16.mxu0 %v876_v0  ;;  %v879_v3 = vld [vmem:[%s1015_s1 + $0x18] sm:$0xff]   ;;  %v884_v4 = vld [vmem:[%s1016_s0] sm:$0xff]   ;;  %v881_v6 = vld [vmem:[%s1015_s1 + $0x28] sm:$0xff]  }
   0x3   :  { %723 = vmatpush3.bf16.msra.mxu0 %v876_v0  ;;  %738 = vmatprep.mubr.bf16.mxu0 %v884_v4  ;;  %v880_v5 = vld [vmem:[%s1015_s1 + $0x20] sm:$0xff]   ;;  %v882_v7 = vld [vmem:[%s1015_s1 + $0x30] sm:$0xff]   ;;  %v883_v8 = vld [vmem:[%s1015_s1 + $0x38] sm:$0xff]  }
   0x4   :  { %724 = vmatprep.subr.bf16.mxu0 %v877_v1  ;;  %v885_v9 = vld [vmem:[%s1016_s0 + $0x8] sm:$0xff]   ;;  %v886_v10 = vld [vmem:[%s1016_s0 + $0x10] sm:$0xff]   ;;  %v887_v11 = vld [vmem:[%s1016_s0 + $0x18] sm:$0xff]  }
   0x5   :  { %v888_v12 = vld [vmem:[%s1016_s0 + $0x20] sm:$0xff]   ;;  %v889_v13 = vld [vmem:[%s1016_s0 + $0x28] sm:$0xff]   ;;  %v890_v14 = vld [vmem:[%s1016_s0 + $0x30] sm:$0xff]  }
   0x6   :  { %v891_v15 = vld [vmem:[%s1016_s0 + $0x38] sm:$0xff]  }
   0x7   :  { %725 = vmatpush3.bf16.msra.mxu0 %v877_v1 }
   0x8   :  { %726 = vmatprep.subr.bf16.mxu0 %v878_v2 }
   0xb   :  { %727 = vmatpush3.bf16.msra.mxu0 %v878_v2  ;;  %v895_v2 = vmov 1.0  }
   0xc   :  { %728 = vmatprep.subr.bf16.mxu0 %v879_v3 }
   0xf   :  { %729 = vmatpush3.bf16.msra.mxu0 %v879_v3 }
  0x10   :  { %730 = vmatprep.subr.bf16.mxu0 %v880_v5 }
  0x13   :  { %731 = vmatpush3.bf16.msra.mxu0 %v880_v5 }
  0x14   :  { %732 = vmatprep.subr.bf16.mxu0 %v881_v6 }
  0x17   :  { %733 = vmatpush3.bf16.msra.mxu0 %v881_v6 }
  0x18   :  { %734 = vmatprep.subr.bf16.mxu0 %v882_v7 }
  0x1b   :  { %735 = vmatpush3.bf16.msra.mxu0 %v882_v7 }
  0x1c   :  { %736 = vmatprep.subr.bf16.mxu0 %v883_v8 }
  0x1f   :  { %737 = vmatpush3.bf16.msra.mxu0 %v883_v8 }
  0x20   :  { %848 = vmatprep.subr.bf16.mxu0 %v892_v16 }
  0x22   :  { %739 = vmatmul.mubr.bf16.vlgmr.msra.gmra.mrb[0].mxu0 %v885_v9 }
  0x23   :  { %742 = vmatprep.mubr.bf16.mxu0 %v886_v10 }
  0x2a   :  { %743 = vmatmul.mubr.bf16.gmra.mrb[4].mxu0 %v887_v11 }
  0x2b   :  { %746 = vmatprep.mubr.bf16.mxu0 %v888_v12 }
  0x32   :  { %747 = vmatmul.mubr.bf16.gmra.mrb[8].mxu0 %v889_v13 }
  0x33   :  { %750 = vmatprep.mubr.bf16.mxu0 %v890_v14 }
  0x3a   :  { %751 = vmatmul.mubr.bf16.gmra.mrb[12].mxu0 %v891_v15 }
  0x3b   :  { %821 = vmatprep.mubr.msk.f32.mxu0 %vm893_vm0, %v894_v17 }
  0xf5   :  { %v740_v18 = vpop.f32.mrb[0].mxu0 }
  0xf6   :  { %v213_v19 = vpop.f32.mrb[1].mxu0  ;;  %v480_v21 = vmul.f32 %v740_v18, %v740_v18 }
  0xf7   :  { %v741_v20 = vpop.f32.mrb[2].mxu0  ;;  %v478_v25 = vmul.f32 %v213_v19, %v213_v19 }
  0xf8   :  { %v633_v22 = vpack.c.bf16 %v741_v20, %v740_v18  ;;  %v481_v23 = vmul.f32 %v741_v20, %v741_v20  ;;  %v216_v24 = vpop.f32.mrb[3].mxu0 }
  0xf9   :  { %v479_v26 = vmul.f32 %v216_v24, %v216_v24  ;;  %v628_v27 = vpack.c.bf16 %v216_v24, %v213_v19 }
  0xfa   :  { %665 = vst [vmem:[%s1017_s2 + $0x8] sm:$0xff] %v633_v22   ;;  %v852_v28 = vpack.c.bf16 %v481_v23, %v480_v21 }
  0xfb   :  { %v849_v29 = vpack.c.bf16 %v479_v26, %v478_v25  ;;  %629 = vst [vmem:[%s1017_s2] sm:$0xff] %v628_v27   ;;  %826 = vmatpush3.bf16.msra.mxu1 %v628_v27 }
  0xfc   :  { %827 = vmatprep.subr.bf16.mxu1 %v892_v16 }
  0xfd   :  { %v744_v30 = vpop.f32.mrb[4].mxu0  ;;  %850 = vmatpush3.bf16.msra.mxu0 %v849_v29 }
  0xfe   :  { %v229_v31 = vpop.f32.mrb[5].mxu0  ;;  %851 = vmatprep.subr.bf16.mxu0 %v892_v16  ;;  %v484_v33 = vmul.f32 %v744_v30, %v744_v30 }
  0xff   :  { %v745_v32 = vpop.f32.mrb[6].mxu0  ;;  %829 = vmatpush3.bf16.msra.mxu1 %v633_v22  ;;  %v482_v37 = vmul.f32 %v229_v31, %v229_v31 }
 0x100   :  { %v643_v34 = vpack.c.bf16 %v745_v32, %v744_v30  ;;  %v485_v35 = vmul.f32 %v745_v32, %v745_v32  ;;  %v232_v36 = vpop.f32.mrb[7].mxu0  ;;  %830 = vmatprep.subr.bf16.mxu1 %v892_v16 }
 0x101   :  { %v638_v38 = vpack.c.bf16 %v232_v36, %v229_v31  ;;  %v483_v39 = vmul.f32 %v232_v36, %v232_v36  ;;  %853 = vmatpush3.bf16.msra.mxu0 %v852_v28 }
 0x102   :  { %667 = vst [vmem:[%s1017_s2 + $0x18] sm:$0xff] %v643_v34   ;;  %v858_v40 = vpack.c.bf16 %v485_v35, %v484_v33  ;;  %854 = vmatprep.subr.bf16.mxu0 %v892_v16 }
 0x103   :  { %666 = vst [vmem:[%s1017_s2 + $0x10] sm:$0xff] %v638_v38   ;;  %v855_v41 = vpack.c.bf16 %v483_v39, %v482_v37  ;;  %832 = vmatpush3.bf16.msra.mxu1 %v638_v38 }
 0x104   :  { %833 = vmatprep.subr.bf16.mxu1 %v892_v16 }
 0x105   :  { %v748_v42 = vpop.f32.mrb[8].mxu0  ;;  %856 = vmatpush3.bf16.msra.mxu0 %v855_v41 }
 0x106   :  { %v245_v43 = vpop.f32.mrb[9].mxu0  ;;  %857 = vmatprep.subr.bf16.mxu0 %v892_v16  ;;  %v488_v45 = vmul.f32 %v748_v42, %v748_v42 }
 0x107   :  { %v749_v44 = vpop.f32.mrb[10].mxu0  ;;  %835 = vmatpush3.bf16.msra.mxu1 %v643_v34  ;;  %v486_v49 = vmul.f32 %v245_v43, %v245_v43 }
 0x108   :  { %v653_v46 = vpack.c.bf16 %v749_v44, %v748_v42  ;;  %v489_v47 = vmul.f32 %v749_v44, %v749_v44  ;;  %v248_v48 = vpop.f32.mrb[11].mxu0  ;;  %836 = vmatprep.subr.bf16.mxu1 %v892_v16 }
 0x109   :  { %v648_v50 = vpack.c.bf16 %v248_v48, %v245_v43  ;;  %v487_v51 = vmul.f32 %v248_v48, %v248_v48  ;;  %859 = vmatpush3.bf16.msra.mxu0 %v858_v40 }
 0x10a   :  { %669 = vst [vmem:[%s1017_s2 + $0x28] sm:$0xff] %v653_v46   ;;  %v864_v52 = vpack.c.bf16 %v489_v47, %v488_v45  ;;  %860 = vmatprep.subr.bf16.mxu0 %v892_v16 }
 0x10b   :  { %668 = vst [vmem:[%s1017_s2 + $0x20] sm:$0xff] %v648_v50   ;;  %v861_v53 = vpack.c.bf16 %v487_v51, %v486_v49  ;;  %838 = vmatpush3.bf16.msra.mxu1 %v648_v50 }
 0x10c   :  { %839 = vmatprep.subr.bf16.mxu1 %v892_v16 }
 0x10d   :  { %v752_v54 = vpop.f32.mrb[12].mxu0  ;;  %862 = vmatpush3.bf16.msra.mxu0 %v861_v53 }
 0x10e   :  { %v261_v55 = vpop.f32.mrb[13].mxu0  ;;  %863 = vmatprep.subr.bf16.mxu0 %v892_v16  ;;  %v492_v57 = vmul.f32 %v752_v54, %v752_v54 }
 0x10f   :  { %v753_v56 = vpop.f32.mrb[14].mxu0  ;;  %841 = vmatpush3.bf16.msra.mxu1 %v653_v46  ;;  %v490_v61 = vmul.f32 %v261_v55, %v261_v55 }
 0x110   :  { %v663_v58 = vpack.c.bf16 %v753_v56, %v752_v54  ;;  %v493_v59 = vmul.f32 %v753_v56, %v753_v56  ;;  %v264_v60 = vpop.f32.mrb[15].mxu0  ;;  %842 = vmatprep.subr.bf16.mxu1 %v892_v16 }
 0x111   :  { %v658_v62 = vpack.c.bf16 %v264_v60, %v261_v55  ;;  %v491_v63 = vmul.f32 %v264_v60, %v264_v60  ;;  %865 = vmatpush3.bf16.msra.mxu0 %v864_v52 }
 0x112   :  { %671 = vst [vmem:[%s1017_s2 + $0x38] sm:$0xff] %v663_v58   ;;  %v870_v0 = vpack.c.bf16 %v493_v59, %v492_v57  ;;  %866 = vmatprep.subr.bf16.mxu0 %v892_v16 }
 0x113   :  { %670 = vst [vmem:[%s1017_s2 + $0x30] sm:$0xff] %v658_v62   ;;  %v867_v1 = vpack.c.bf16 %v491_v63, %v490_v61  ;;  %844 = vmatpush3.bf16.msra.mxu1 %v658_v62 }
 0x114   :  { %845 = vmatprep.subr.bf16.mxu1 %v892_v16 }
 0x115   :  { %868 = vmatpush3.bf16.msra.mxu0 %v867_v1 }
 0x116   :  { %869 = vmatprep.subr.bf16.mxu0 %v892_v16 }
 0x117   :  { %847 = vmatpush3.bf16.msra.mxu1 %v663_v58 }
 0x119   :  { %871 = vmatpush3.bf16.msra.mxu0 %v870_v0 }
 0x11a   :  { %787 = vmatmul.mubr.f32.vlgmr.msra.gmra.mrb[0].mxu1 %v895_v2 }
 0x11c   :  { %822 = vmatmul.mubr.f32.vlgmr.msra.gmra.mrb[16].mxu0 %v895_v2 }
 0x1ed   :  { %v473_v3 = vpop.f32.mrb[0].mxu1 }
 0x1ee   :  { %477 = vst [vmem:[%s1018_s3] sm:$0xff] %v473_v3  ;;  %v788_v4 = vpop.f32.mrb[1].mxu1 }
 0x1ef   :  { %v560_v5 = vpop.f32.mrb[16].mxu0 }
 0x1f0   :  { %564 = vst [vmem:[%s1019_s4] sm:$0xff] %v560_v5  ;;  %v823_v6 = vpop.f32.mrb[17].mxu0 }

</bundles_post_ra>
